<compile_context>
chip_gen: v6e
topology: v6e:2x2x1
jax: 0.10.0
libtpu: 0.0.40
codegen_flags: <defaults>
</compile_context>

<pallas_src>
import functools

import jax
import jax.numpy as jnp
from jax.experimental import pallas as pl
from jax.experimental.pallas import tpu as pltpu

PAD = 0  # Constants.PAD


def _make_cycle_loss_kernel(n_rows, tile_n, vocab, chunk_v):
    """Returns a kernel with the static problem parameters baked in."""
    chunk_starts = list(range(0, vocab, chunk_v))

    def kernel(x_ref, t_ref, out_ref):
        # x_ref:   [tile_n, V] probabilities (native dtype)
        # t_ref:   [tile_n, 1] int32 targets
        # out_ref: [8, 128] f32 partials: rows 0..3 hold -sum(logp), rows 4..7 the count.
        t = t_ref[...]                                               # [tile_n, 1]

        # Edge-tile masking: the last grid step may read past N (no wrapper padding),
        # so fold the global-row bound into `valid` alongside the PAD mask.
        row = jax.lax.broadcasted_iota(jnp.int32, (tile_n, 1), 0)
        row_global = pl.program_id(0) * tile_n + row
        valid = jnp.logical_and(t != PAD, row_global < n_rows)       # [tile_n, 1] bool

        # Chunked gather-before-log over the vocab axis.  Each row's target lives in
        # exactly one chunk, so only scalar partial sums are carried across chunks
        # (no [tile_n, V] or [tile_n, 128] accumulator ever materializes).
        log_sum = jnp.zeros((), jnp.float32)
        for start in chunk_starts:
            width = min(chunk_v, vocab - start)
            xc = x_ref[:, pl.ds(start, width)]                       # [tile_n, width]
            col = start + jax.lax.broadcasted_iota(jnp.int32, (tile_n, width), 1)
            sel = jnp.where(col == t, xc, jnp.zeros_like(xc))
            # Exactly <=1 nonzero per row -> lane sum is exact in the native dtype.
            picked = jnp.sum(sel, axis=-1, keepdims=True).astype(jnp.float32)
            hit = jnp.logical_and(
                valid, jnp.logical_and(t >= start, t < start + width))
            # jnp.where keeps any NaN from garbage edge rows out of the sum.
            contrib = jnp.where(hit, jnp.log(picked + 1e-10), 0.0)
            log_sum = log_sum + jnp.sum(contrib)
            # NOTE: an out-of-range target (torch would raise) never "hits" and thus
            # silently contributes 0 to the sum while still counting as valid.

        cnt = jnp.sum(valid.astype(jnp.float32))

        r = jax.lax.broadcasted_iota(jnp.int32, out_ref.shape, 0)
        out_ref[...] = jnp.where(r < 4, -log_sum, cnt)               # one unmasked vst

    return kernel


def _plan_tiling(n_rows, vocab, itemsize, requested_tile_n, requested_chunk_v):
    """Pick tile_n / chunk_v and a vmem limit coupled to the real allocation."""
    try:
        vmem_cap = int(pltpu.get_tpu_info().vmem_capacity_bytes)
    except Exception:
        vmem_cap = 64 * 1024 * 1024  # v7x is the smallest per-TC VMEM

    chunk_v = requested_chunk_v if requested_chunk_v is not None else min(vocab, 2048)
    chunk_v = int(min(chunk_v, vocab))
    assert chunk_v % 128 == 0, "chunk_v must be a multiple of 128"

    n_rounded = max(8, ((n_rows + 7) // 8) * 8)
    tile_n = requested_tile_n if requested_tile_n is not None else 2048
    tile_n = int(max(8, (min(tile_n, n_rounded) // 8) * 8))

    # Keep >= ~4 grid steps when N allows it (v7x shards the parallel axis over 2 TCs).
    balance_cap = max(8, ((pl.cdiv(n_rows, 4) + 7) // 8) * 8)
    tile_n = max(8, min(tile_n, balance_cap))

    def vmem_need(tn):
        x_blk = tn * vocab * itemsize          # x block, double-buffered below
        t_blk = tn * 128 * 4                   # int32 targets block (lane-padded)
        tmp = tn * chunk_v * 4 * 2             # headroom for per-chunk masked temp
        out_blk = 8 * 128 * 4
        return 2 * x_blk + 2 * t_blk + 2 * out_blk + tmp + (4 << 20)

    budget = int(vmem_cap * 0.85)
    while tile_n > 8 and vmem_need(tile_n) > budget:
        tile_n = max(8, ((tile_n // 2) // 8) * 8)

    vmem_limit = int(min(max(vmem_need(tile_n), 32 << 20), budget))
    return tile_n, chunk_v, vmem_limit


def cycle_loss(inputs, targets, *, tile_n=None, chunk_v=None):
    """inputs: [B, T, V] float probabilities; targets: [B, T] int. Returns scalar loss."""
    B, T, V = inputs.shape
    N = B * T
    assert V % 128 == 0, "vocab size must be a multiple of 128 for lane tiling"

    x = inputs.reshape(N, V)                      # native dtype, no f32 copy, no padding
    t = targets.reshape(N, 1).astype(jnp.int32)

    itemsize = x.dtype.itemsize
    tile_n, chunk_v, vmem_limit = _plan_tiling(N, V, itemsize, tile_n, chunk_v)
    num_tiles = pl.cdiv(N, tile_n)
    num_chunks = pl.cdiv(V, chunk_v)

    kernel = _make_cycle_loss_kernel(N, tile_n, V, chunk_v)

    cost = pl.CostEstimate(
        flops=3 * N * V,                          # compare + select + reduce-add
        transcendentals=N * num_chunks,           # one log per row per chunk
        bytes_accessed=N * V * itemsize + N * 4 + num_tiles * 8 * 128 * 4,
    )

    partials = pl.pallas_call(
        kernel,
        out_shape=jax.ShapeDtypeStruct((num_tiles * 8, 128), jnp.float32),
        grid_spec=pltpu.PrefetchScalarGridSpec(
            num_scalar_prefetch=0,
            grid=(num_tiles,),
            in_specs=[
                pl.BlockSpec((tile_n, V), lambda i: (i, 0)),
                pl.BlockSpec((tile_n, 1), lambda i: (i, 0)),
            ],
            out_specs=pl.BlockSpec((8, 128), lambda i: (i, 0)),
        ),
        compiler_params=pltpu.CompilerParams(
            dimension_semantics=("parallel",),    # independent tiles -> both TCs on v7x
            vmem_limit_bytes=vmem_limit,          # coupled to the actual allocation
        ),
        cost_estimate=cost,
    )(x, t)

    blk = partials.reshape(num_tiles, 8, 128)
    loss_sum = jnp.sum(blk[:, 0, 0])
    loss_cnt = jnp.sum(blk[:, 4, 0])
    # NaN if every target is PAD (0/0) — identical to torch NLLLoss(ignore_index=PAD).
    return loss_sum / loss_cnt


def _reference_loss(inputs, targets):
    B, T, V = inputs.shape
    logp = jnp.log(inputs.reshape(-1, V).astype(jnp.float32) + 1e-10)
    t = targets.reshape(-1).astype(jnp.int32)
    picked = jnp.take_along_axis(logp, t[:, None], axis=1)[:, 0]
    mask = (t != PAD).astype(jnp.float32)
    return -jnp.sum(picked * mask) / jnp.sum(mask)


if __name__ == "__main__":
    key = jax.random.PRNGKey(0)

    # Case 1: small [B x T x vocab] with some PAD targets.
    B, T, V = 2, 8, 256
    k1, k2, k3, k4 = jax.random.split(key, 4)
    logits = jax.random.normal(k1, (B, T, V), dtype=jnp.float32)
    inputs = jax.nn.softmax(logits, axis=-1)                 # probabilities
    targets = jax.random.randint(k2, (B, T), 0, V, dtype=jnp.int32)
    targets = targets.at[:, -2:].set(PAD)                    # exercise ignore_index

    loss = jax.block_until_ready(cycle_loss(inputs, targets))
    ref = _reference_loss(inputs, targets)
    assert jnp.allclose(loss, ref, rtol=1e-5, atol=1e-5), (loss, ref)

    # Case 2: ragged N (exercises the in-kernel edge-tile row mask — no padding now).
    B2, T2 = 3, 7
    logits2 = jax.random.normal(k3, (B2, T2, V), dtype=jnp.float32)
    inputs2 = jax.nn.softmax(logits2, axis=-1)
    targets2 = jax.random.randint(k4, (B2, T2), 0, V, dtype=jnp.int32)
    targets2 = targets2.at[:, :1].set(PAD)
    loss2 = jax.block_until_ready(cycle_loss(inputs2, targets2))
    ref2 = _reference_loss(inputs2, targets2)
    assert jnp.allclose(loss2, ref2, rtol=1e-5, atol=1e-5), (loss2, ref2)

    # Case 3: force multiple grid tiles and multiple vocab chunks.
    loss3 = jax.block_until_ready(cycle_loss(inputs, targets, tile_n=8, chunk_v=128))
    assert jnp.allclose(loss3, ref, rtol=1e-5, atol=1e-5), (loss3, ref)

    print("KERNEL_OK")
</pallas_src>

<mosaic_0001>
module attributes {stable_mosaic.version = 11 : i64} {
  func.func @kernel(%arg0: i32, %arg1: memref<8x256xf32, #tpu.memory_space<vmem>>, %arg2: memref<8x1xi32, #tpu.memory_space<vmem>>, %arg3: memref<8x128xf32, #tpu.memory_space<vmem>>) attributes {dimension_semantics = [#tpu.dimension_semantics<parallel>], iteration_bounds = array<i64: 2>, scalar_prefetch = 0 : i64, scratch_operands = 0 : i64, tpu.core_type = #tpu.core_type<tc>, window_params = [{transform_indices = @transform_0, window_bounds = array<i64: 8, 256>}, {transform_indices = @transform_1, window_bounds = array<i64: 8, 1>}, {transform_indices = @transform_2, window_bounds = array<i64: 8, 128>}]} {
    %c0 = arith.constant 0 : index
    %c0_0 = arith.constant 0 : index
    %0 = vector.load %arg2[%c0, %c0_0] : memref<8x1xi32, #tpu.memory_space<vmem>>, vector<8x1xi32>
    %1 = tpu.iota {dimensions = array<i32: 0>} : vector<8x1xi32>
    %c8_i32 = arith.constant 8 : i32
    %2 = arith.muli %arg0, %c8_i32 : i32
    %3 = vector.broadcast %2 : i32 to vector<8x1xi32>
    %4 = arith.addi %3, %1 : vector<8x1xi32>
    %c0_i32 = arith.constant 0 : i32
    %5 = vector.broadcast %c0_i32 : i32 to vector<8x1xi32>
    %6 = arith.cmpi ne, %0, %5 : vector<8x1xi32>
    %c16_i32 = arith.constant 16 : i32
    %7 = vector.broadcast %c16_i32 : i32 to vector<8x1xi32>
    %8 = arith.cmpi slt, %4, %7 : vector<8x1xi32>
    %9 = arith.andi %6, %8 : vector<8x1xi1>
    %c0_1 = arith.constant 0 : index
    %c0_2 = arith.constant 0 : index
    %10 = vector.load %arg1[%c0_1, %c0_2] : memref<8x256xf32, #tpu.memory_space<vmem>>, vector<8x256xf32>
    %11 = tpu.iota {dimensions = array<i32: 1>} : vector<8x256xi32>
    %c0_i32_3 = arith.constant 0 : i32
    %12 = vector.broadcast %c0_i32_3 : i32 to vector<8x256xi32>
    %13 = arith.addi %12, %11 : vector<8x256xi32>
    %14 = vector.broadcast %0 : vector<8x1xi32> to vector<8x256xi32>
    %15 = arith.cmpi eq, %13, %14 : vector<8x256xi32>
    %cst = arith.constant 0.000000e+00 : f32
    %16 = vector.broadcast %cst : f32 to vector<8x256xf32>
    %17 = arith.select %15, %10, %16 : vector<8x256xi1>, vector<8x256xf32>
    %cst_4 = arith.constant dense<0.000000e+00> : vector<8xf32>
    %18 = vector.multi_reduction <add>, %17, %cst_4 [1] : vector<8x256xf32> to vector<8xf32>
    %19 = vector.shape_cast %18 : vector<8xf32> to vector<8x1xf32>
    %c0_i32_5 = arith.constant 0 : i32
    %20 = vector.broadcast %c0_i32_5 : i32 to vector<8x1xi32>
    %21 = arith.cmpi sge, %0, %20 : vector<8x1xi32>
    %c256_i32 = arith.constant 256 : i32
    %22 = vector.broadcast %c256_i32 : i32 to vector<8x1xi32>
    %23 = arith.cmpi slt, %0, %22 : vector<8x1xi32>
    %24 = arith.andi %21, %23 : vector<8x1xi1>
    %25 = arith.andi %9, %24 : vector<8x1xi1>
    %cst_6 = arith.constant 1.000000e-10 : f32
    %26 = vector.broadcast %cst_6 : f32 to vector<8x1xf32>
    %27 = arith.addf %19, %26 : vector<8x1xf32>
    %28 = math.log %27 : vector<8x1xf32>
    %cst_7 = arith.constant 0.000000e+00 : f32
    %29 = vector.broadcast %cst_7 : f32 to vector<8x1xf32>
    %30 = arith.select %25, %28, %29 : vector<8x1xi1>, vector<8x1xf32>
    %31 = vector.shape_cast %30 : vector<8x1xf32> to vector<1x8x1xf32>
    %cst_8 = arith.constant dense<0.000000e+00> : vector<1xf32>
    %32 = vector.multi_reduction <add>, %31, %cst_8 [1, 2] : vector<1x8x1xf32> to vector<1xf32>
    %33 = vector.shape_cast %32 : vector<1xf32> to vector<1x1x1xf32>
    %34 = vector.extract %33[0, 0, 0] : f32 from vector<1x1x1xf32>
    %cst_9 = arith.constant 0.000000e+00 : f32
    %35 = arith.addf %cst_9, %34 : f32
    %36 = arith.extui %9 : vector<8x1xi1> to vector<8x1xi32>
    %37 = arith.sitofp %36 : vector<8x1xi32> to vector<8x1xf32>
    %38 = vector.shape_cast %37 : vector<8x1xf32> to vector<1x8x1xf32>
    %cst_10 = arith.constant dense<0.000000e+00> : vector<1xf32>
    %39 = vector.multi_reduction <add>, %38, %cst_10 [1, 2] : vector<1x8x1xf32> to vector<1xf32>
    %40 = vector.shape_cast %39 : vector<1xf32> to vector<1x1x1xf32>
    %41 = vector.extract %40[0, 0, 0] : f32 from vector<1x1x1xf32>
    %42 = tpu.iota {dimensions = array<i32: 0>} : vector<8x128xi32>
    %c4_i32 = arith.constant 4 : i32
    %43 = vector.broadcast %c4_i32 : i32 to vector<8x128xi32>
    %44 = arith.cmpi slt, %42, %43 : vector<8x128xi32>
    %cst_11 = arith.constant 0.000000e+00 : f32
    %45 = arith.subf %cst_11, %35 : f32
    %46 = vector.broadcast %45 : f32 to vector<8x128xf32>
    %47 = vector.broadcast %41 : f32 to vector<8x128xf32>
    %48 = arith.select %44, %46, %47 : vector<8x128xi1>, vector<8x128xf32>
    %c0_12 = arith.constant 0 : index
    %c0_13 = arith.constant 0 : index
    %49 = vector.load %arg3[%c0_12, %c0_13] : memref<8x128xf32, #tpu.memory_space<vmem>>, vector<8x128xf32>
    tpu.vector_store %arg3[%c0_12, %c0_13], %48 {strides = array<i32>} : memref<8x128xf32, #tpu.memory_space<vmem>>, vector<8x128xf32>,
    return
  }
  func.func @transform_0(%arg0: i32) -> (i32, i32) {
    %c0_i32 = arith.constant 0 : i32
    %c0_i32_0 = arith.constant 0 : i32
    return %arg0, %c0_i32 : i32, i32
  }
  func.func @transform_1(%arg0: i32) -> (i32, i32) {
    %c0_i32 = arith.constant 0 : i32
    %c0_i32_0 = arith.constant 0 : i32
    return %arg0, %c0_i32 : i32, i32
  }
  func.func @transform_2(%arg0: i32) -> (i32, i32) {
    %c0_i32 = arith.constant 0 : i32
    %c0_i32_0 = arith.constant 0 : i32
    return %arg0, %c0_i32 : i32, i32
  }
}

</mosaic_0001>

<bundles_post_ra>
// kernel: tpu_custom_call.1
= control target key start
LH: loop header
LB: loop body
LE: loop exit
PB: predicated region body
PF: predicated region fallthrough
CT: control target
= control target key end

     0   :  { %7 = vsyncpa [#allocation3], 0  ;;  %s674_s0 = inlined_call_operand.hbm [shape: f32[16,256], index: 0, kind: input, shape index: {}]   ;;  %s675_s1 = inlined_call_operand.vmem [shape: s32[16,1], index: 1, kind: input, shape index: {}]   ;;  %s676_s2 = inlined_call_operand.hbm [shape: f32[16,128], index: 2, kind: output, shape index: {}]  }
   0x1   :  { %9 = vsyncpa [#allocation3 + $0x1], 0 }
   0x2   :  { %10 = vsyncpa [#allocation4], 0 }
   0x3   :  { %12 = vsyncpa [#allocation4 + $0x1], 0  ;;  %s520_s9 = smov 0   ;;  %s522_s10 = smov 0  }
   0x4   :  { %s524_s11 = smov 0   ;;  %s526_s12 = smov 0  }
   0x5 LB: > { %s541_s13 = sadd.s32 4294967295, %s499_s12   ;;  %s335_s14 = sadd.s32 4294967294, %s499_s12   ;;  %s499_s12 = sphi %s526_s12, %s693_s12   ;;  %s495_s11 = sphi %s524_s11, %s692_s11   ;;  %s491_s10 = sphi %s522_s10, %s691_s10   ;;  %s487_s9 = sphi %s520_s9, %s690_s9  }
   0x6   : > { %s545_s15 = sadd.s32 1, %s499_s12   ;;  %s25_s16 = sadd.s32 1, %s495_s11 }
   0x7   : > { %s22_s17 = ssub.s32 %s499_s12, %s545_s15  ;;  %p32_p0 = scmp.ne.s32.totalorder %s495_s11, %s491_s10 }
   0x8   : > { %p23_p1 = scmp.eq.s32.totalorder %s22_s17, 0  ;;  %p33_p2 = scmp.eq.s32.totalorder %s499_s12, 0 }
   0x9   : > { %p38_p3 = scmp.ne.s32.totalorder %s491_s10, %s487_s9  ;;  %p39_p4 = scmp.eq.s32.totalorder %s541_s13, 0 }
   0xa   : > { %s557_s18 = scalar_select %p23_p1, %s495_s11, %s25_s16  }
   0xb   : > { %p559_p5 = por %p33_p2, %p32_p0  ;;  %p563_p6 = por %p39_p4, %p38_p3 }
   0xc   : > { %p88_p7 = scmp.eq.s32.totalorder %s541_s13, 1  ;;  %p94_p8 = scmp.eq.s32.totalorder %s335_s14, 1 }
   0xd   : > { %s680_s20 = scalar_select %p563_p6, 1, 0 }
   0xe   : > { %p368_p10 = scmp.lt.s32.totalorder %s499_s12, 2  ;;  %p570_p11 = por %p88_p7, %p32_p0 }
   0xf   : > { %p574_p12 = por %p94_p8, %p38_p3  ;;  %s114_s23 = sand.u32 1, %s495_s11  }
  0x10   : > { %s681_s21 = scalar_select %p570_p11, 1, 0 }
  0x11   : > { %s682_s22 = scalar_select %p574_p12, 1, 0 }
  0x12   : > { %s351_s24 = sshll.u32 %s499_s12, 8  ;;  %s338_s25 = sshll.u32 %s114_s23, 4 }
  0x13   : > { %s583_s28 = scalar_lea.hbm %s674_s0, %s351_s24  ;;  %s118_s29 = scalar_lea.vmem [#allocation2], %s338_s25 }
  0x14   : > { %s126_s30 = sshll.u32 %s118_s29, 4  ;;  %p587_p13 = pnand %p368_p10, %p559_p5  ;;  %s591_s30 = int_to_ptr.vmem [resolvable:$true] %s126_s30 }
  0x15   : > { %s115_s4 = scalar_lea.sflag [#allocation3], %s114_s23  ;;  %s407_s5 = scalar_lea.hbm %s583_s28, 256 }
  0x16   : > { %p408_p2 = scmp.ne.s32.totalorder %s583_s28, %s407_s5  ;;  %p409_p3 = pneg %p587_p13 }
  0x17   : > { %s412_s8 = scalar_lea.hbm %s674_s0, 512  ;;  %p413_p5 = scmp.lt.s32.totalorder %s583_s28, %s674_s0 }
  0x18   : > { %p410_p4 = pnand %p409_p3, %p408_p2  ;;  %p414_p8 = scmp.lt.s32.totalorder %s412_s8, %s407_s5 }
  0x1a   : > { %p411_p7 = pneg %p410_p4  ;;  %p415_p10 = por %p414_p8, %p413_p5 }
  0x1c   : > { %p416_p9 = pnand %p415_p10, %p411_p7 }
  0x1e   : > { %419 = shalt.err (!%p416_p9)
}
  0x1f   : > { %s420_s17 = scalar_lea.vmem %s591_s30, 256  ;;  %s501_s19 = smov [#allocation2]  }
  0x20   : > { %p421_p0 = scmp.ne.s32.totalorder %s591_s30, %s420_s17  ;;  %s425_s23 = sshll.u32 %s501_s19, 4  ;;  %s426_s23 = int_to_ptr.vmem [resolvable:$false] %s425_s23 }
  0x21   : > { %s427_s24 = scalar_lea.vmem %s426_s23, 512  ;;  %p428_p4 = scmp.lt.s32.totalorder %s591_s30, %s426_s23 }
  0x22   : > { %p423_p1 = pnand %p421_p0, %p409_p3  ;;  %p429_p12 = scmp.lt.s32.totalorder %s427_s24, %s420_s17 }
  0x24   : > { %p424_p2 = pneg %p423_p1  ;;  %p430_p11 = por %p429_p12, %p428_p4 }
  0x26   : > { %p431_p6 = pnand %p430_p11, %p424_p2 }
  0x28   : > { %434 = shalt.err (!%p431_p6)
}
  0x29   : > { %363 = dma.hbm_to_vmem [thread:$0]  (!%p587_p13), %s583_s28, 256, %s591_s30, %s115_s4  }
  0x2a   : > { %p684_p9 = scmp.lt.s32.totalorder %s499_s12, 3  ;;  %p685_p7 = scmp.ge.s32.totalorder %s499_s12, 1 }
  0x2c   : > { %p139_p0 = pnand %p685_p7, %p684_p9 }
  0x2d   : > { %s618_s25 = sand.u32 (!%p139_p0), 1, %s491_s10   ;;  %p686_p6 = scmp.ne.s32.totalorder (!%p139_p0), %s680_s20, 0 }
  0x2e   : > { %142 = sbr.rel (%p139_p0) target bundleno = 564 (0x234), region = 28  ;;  %s342_s26 = sshll.u32 (!%p139_p0), %s618_s25, 4 }
  0x2f   : > { %s145_s27 = scalar_lea.sflag (!%p139_p0), [#allocation3], %s618_s25  ;;  %s148_s29 = scalar_lea.vmem (!%p139_p0), [#allocation2], %s342_s26 }
  0x33   : > { %478 = dma.done.wait (%p686_p6), %s145_s27, 256  }
  0x34   : > { %480 = vsyncadd (%p686_p6), %s145_s27, 4294967040  ;;  %p173_p11 = scmp.lt.s32.totalorder %s541_s13, 1  ;;  %v502_v0 = vmov 0   ;;  %v178_v2 = vlaneseq  ;;  %v186_v5 = vld [vmem:[%s148_s29] sm:$0xff]  ;;  %v187_v6 = vld [vmem:[%s148_s29 + $0x8] sm:$0xff]  ;;  %s345_s20 = sshll.u32 %s541_s13, 3 }
  0x35   : > { %404 = vset.pattern.permute.xlu0 %v502_v0  ;;  %v181_v14 = vstv %s345_s20  ;;  %vm209_vm9 = vcmask 7168   ;;  %v503_v19 = vmov 0.0   ;;  %s343_s6 = sshll.u32 %s618_s25, 3  ;;  %s348_s14 = sshll.u32 %s541_s13, 7 }
  0x36   : > { %s174_s28 = scalar_select %p173_p11, %s541_s13, 1  ;;  %v189_v3 = vand.u32 127, %v178_v2  ;;  %v179_v13 = vshrl.u32 %v178_v2, 7 }
  0x37   : > { %s172_s16 = scalar_lea.vmem [#allocation5], %s343_s6  ;;  %s637_s26 = scalar_lea.hbm %s676_s2, %s348_s14 }
  0x38   : > { %s344_s30 = sshll.u32 %s174_s28, 3  ;;  %v190_v4 = vadd.s32 128, %v189_v3  ;;  %v182_v15 = vadd.s32 %v181_v14, %v179_v13  ;;  %s253_s17 = sshll.u32 %s172_s16, 4  ;;  %vm233_vm10 = vcmp.lt.s32.totalorder %v179_v13, 4  ;;  %s254_s17 = int_to_ptr.vmem [resolvable:$true] %s253_s17 }
  0x39   : > { %s176_s5 = scalar_lea.vmem %s675_s1, %s344_s30  ;;  %s240_s27 = scalar_lea.sflag [#allocation4], %s618_s25 }
  0x3a   : > { %v177_v1 = vld [vmem:[%s176_s5] sm:$0xff]  ;;  %vm184_vm5 = vcmp.lt.s32.totalorder %v182_v15, 16  ;;  %s435_s29 = scalar_lea.vmem %s254_s17, 128  ;;  %p687_p13 = scmp.ne.s32.totalorder %s681_s21, 0 }
  0x3b   : > { %192 = vperm.xlu0 %404, %v177_v1   ;;  %vm201_vm2 = vcmp.ge.s32.totalorder %v177_v1, 0  ;;  %vm202_vm3 = vcmp.lt.s32.totalorder %v177_v1, 256  ;;  %vm183_vm4 = vcmp.ne.s32.totalorder %v177_v1, 0  ;;  %p436_p12 = scmp.ne.s32.totalorder %s254_s17, %s435_s29  ;;  %s504_s13 = smov [#allocation5]  }
  0x3c   : > { %vm203_vm6 = vmand %vm201_vm2, %vm202_vm3  ;;  %s439_s28 = sshll.u32 %s504_s13, 4  ;;  %s440_s28 = int_to_ptr.vmem [resolvable:$false] %s439_s28 }
  0x3d   : > { %vm185_vm7 = vmand %vm183_vm4, %vm184_vm5  ;;  %p437_p1 = pnand %p436_p12, %p687_p13  ;;  %s441_s30 = scalar_lea.vmem %s440_s28, 256 }
  0x3e   : > { %vm204_vm8 = vmand %vm185_vm7, %vm203_vm6  ;;  %v346_v20 = vsel %vm185_vm7, 1.0, %v503_v19  ;;  %p442_p5 = scmp.lt.s32.totalorder %s254_s17, %s440_s28  ;;  %p443_p8 = scmp.lt.s32.totalorder %s441_s30, %s435_s29 }
  0x3f   : > { %v223_v22 = vsel %vm209_vm9, %v346_v20, 0.0  ;;  %p438_p3 = pneg %p437_p1 }
  0x40   : > { %p444_p10 = por %p443_p8, %p442_p5 }
  0x42   : > { %p445_p2 = pnand %p444_p10, %p438_p3 }
  0xb6   : > { %v193_v7 = vpop.permute.xlu0 %192 }
  0xb7   : > { %vm194_vm0 = vcmp.eq.s32.totalorder %v189_v3, %v193_v7  ;;  %vm195_vm1 = vcmp.eq.s32.totalorder %v190_v4, %v193_v7 }
  0xb8   : > { %v196_v8 = vsel %vm194_vm0, %v186_v5, 0.0  ;;  %v197_v9 = vsel %vm195_vm1, %v187_v6, 0.0 }
  0xb9   : > { %v198_v10 = vadd.f32 %v197_v9, %v196_v8 }
  0xbb   : > { %199 = vadd.xlane.f32.xlu0 %v198_v10 }
 0x144   : > { %v200_v11 = vpop.xlane.xlu0 %199 }
 0x145   : > { %v205_v12 = vadd.f32 1e-10, %v200_v11 }
 0x147   : > { %405 = vlog2.f32 %v205_v12 }
 0x154   : > { %v406_v16 = vpop.eup %405 }
 0x155   : > { %v207_v17 = vmul.f32 0.6931472, %v406_v16 }
 0x157   : > { %v208_v18 = vsel %vm204_vm8, %v207_v17, 0.0 }
 0x158   : > { %v210_v21 = vsel %vm209_vm9, %v208_v18, 0.0 }
 0x159   : > { %211 = vadd.xlane.f32.xlu1 %v210_v21 }
 0x15d   : > { %224 = vadd.xlane.f32.xlu1 %v223_v22 }
 0x1e2   : > { %v212_v23 = vpop.xlane.xlu1 %211 }
 0x1e3   : > { %v213_v24 = vrot.slane %v212_v23, 4 }
 0x1e5   : > { %v214_v25 = vadd.f32 %v213_v24, %v212_v23 }
 0x1e6   : > { %v225_v26 = vpop.xlane.xlu1 %224 }
 0x1e7   : > { %v215_v27 = vrot.slane %v214_v25, 2  ;;  %v226_v28 = vrot.slane %v225_v26, 4 }
 0x1e9   : > { %v227_v29 = vadd.f32 %v226_v28, %v225_v26  ;;  %v216_v30 = vadd.f32 %v215_v27, %v214_v25 }
 0x1eb   : > { %v228_v31 = vrot.slane %v227_v29, 2  ;;  %v217_v32 = vrot.slane %v216_v30, 1 }
 0x1ed   : > { %v229_v33 = vadd.f32 %v228_v31, %v227_v29  ;;  %v218_v34 = vadd.f32 %v217_v32, %v216_v30 }
 0x1ef   : > { %352 = vpush %v218_v34  ;;  %v230_v35 = vrot.slane %v229_v33, 1 }
 0x1f1   : > { %v231_v36 = vadd.f32 %v230_v35, %v229_v33 }
 0x1f3   : > { %354 = vpush %v231_v36 }
 0x220   : > { %s353_s7 = spop %352 }
 0x221   : > { %s234_s8 = ssub.f32 0.0, %s353_s7 }
 0x223   : > { %v235_v37 = vstv %s234_s8 }
 0x224   : > { %s355_s19 = spop %354 }
 0x225   : > { %v236_v38 = vstv %s355_s19 }
 0x226   : > { %v237_v39 = vsel %vm233_vm10, %v235_v37, %v236_v38 }
 0x227   : > { %238 = vst [vmem:[%s172_s16] sm:$0xff] %v237_v39 }
 0x228   : > { %448 = shalt.err (!%p445_p2)
}
 0x229   : > { %s449_s3 = scalar_lea.hbm %s637_s26, 128  ;;  %s453_s5 = scalar_lea.hbm %s676_s2, 256 }
 0x22a   : > { %p450_p4 = scmp.ne.s32.totalorder %s637_s26, %s449_s3  ;;  %p454_p0 = scmp.lt.s32.totalorder %s637_s26, %s676_s2 }
 0x22b   : > { %p455_p6 = scmp.lt.s32.totalorder %s453_s5, %s449_s3 }
 0x22c   : > { %p451_p9 = pnand %p450_p4, %p687_p13 }
 0x22d   : > { %p456_p11 = por %p455_p6, %p454_p0 }
 0x22e   : > { %p452_p7 = pneg %p451_p9 }
 0x230   : > { %p457_p12 = pnand %p456_p11, %p452_p7 }
 0x232   : > { %460 = shalt.err (!%p457_p12)
}
 0x233   : > { %358 = dma.vmem_to_hbm [thread:$0]  (%p687_p13), %s254_s17, 128, %s637_s26, %s240_s27  }
 0x234 PF: > { %s265_s7 = sand.u32 1, %s487_s9   ;;  %p688_p1 = scmp.ne.s32.totalorder %s682_s22, 0 }
 0x235   : > { %p689_p3 = scmp.ge.s32.totalorder %s499_s12, 2  ;;  %s266_s8 = scalar_lea.sflag [#allocation4], %s265_s7 }
 0x237   : > { %p365_p5 = pnand %p689_p3, %p688_p1 }
 0x239   : > { %p366_p8 = pneg %p365_p5 }
 0x23b   : > { %482 = dma.done.wait (%p366_p8), %s266_s8, 128  }
 0x23c   : > { %484 = vsyncadd (%p366_p8), %s266_s8, 4294967168  ;;  %p15_p10 = scmp.ge.s32.totalorder %s545_s15, 4   ;;  %s690_s9 = smov %s491_s10 }
 0x23d   : > { %s691_s10 = smov %s495_s11  ;;  %s692_s11 = smov %s557_s18 }
 0x23e   : > { %s693_s12 = smov %s545_s15  ;;  %17 = sbr.rel (!%p15_p10) target bundleno = 5 (0x5), region = 76 }
 0x243   :  { %271 = vsyncpa [#allocation3], 1 }
 0x244   :  { %273 = vsyncpa [#allocation3 + $0x1], 1 }
 0x245   :  { %274 = vsyncpa [#allocation4], 1 }
 0x246   :  { %276 = vsyncpa [#allocation4 + $0x1], 1 }

</bundles_post_ra>
